<compile_context>
chip_gen: v7x
topology: tpu7x:2x2x1
jax: 0.10.0
libtpu: 0.0.40
codegen_flags: <defaults>
</compile_context>

<pallas_src>
import jax
import jax.numpy as jnp
from jax import lax
from jax.experimental import pallas as pl
from jax.experimental.pallas import tpu as pltpu


def self_attention_kernel(x_ref, w_ref, b_ref, o_ref):
    # x_ref block: (1, S, D) ; w_ref: (D, 3D) fused QKV ; b_ref: (1, 3D)
    x = x_ref[0]                                   # (S, D)
    D = x.shape[-1]

    # Single fused projection (scale for Q already folded into w/b in wrapper).
    qkv = jnp.dot(x, w_ref[...], preferred_element_type=jnp.float32)       # (S, 3D) f32
    qkv = qkv + b_ref[...].astype(jnp.float32)
    # Keep matmul operands in the input dtype (bf16 inputs -> bf16 MXU pushes).
    qkv = qkv.astype(x.dtype)

    q = qkv[:, :D]
    k = qkv[:, D:2 * D]
    v = qkv[:, 2 * D:]

    # scores = (Q * 1/sqrt(D)) @ K^T, contraction expressed directly -> no k.T
    scores = lax.dot_general(
        q, k,
        dimension_numbers=(((1,), (1,)), ((), ())),
        preferred_element_type=jnp.float32)                                # (S, S) f32

    # Numerically stable softmax, normalization deferred to the (S, D) result.
    m = jnp.max(scores, axis=-1, keepdims=True)                            # (S, 1)
    e = jnp.exp(scores - m)                                                # (S, S)
    s = jnp.sum(e, axis=-1, keepdims=True)                                 # (S, 1)

    attended = jnp.dot(e.astype(v.dtype), v,
                       preferred_element_type=jnp.float32)                 # (S, D) f32
    inv_s = pl.reciprocal(s, approx=True)                                  # EUP slot
    out = attended * inv_s + x.astype(jnp.float32)                         # residual add
    o_ref[0] = out.astype(o_ref.dtype)


def self_attention(x, wq, bq, wk, bk, wv, bv):
    """x: (B, S, D).  w*: (D, D) stored as (in, out).  b*: (D,)."""
    B, S, D = x.shape
    scale = 1.0 / (float(D) ** 0.5)

    # Fold the softmax scale into the query projection (exact in real
    # arithmetic) and fuse Q/K/V into one (D, 3D) weight + (1, 3D) bias.
    w_qkv = jnp.concatenate([wq * scale, wk, wv], axis=1).astype(x.dtype)   # (D, 3D)
    b_qkv = jnp.concatenate([bq * scale, bk, bv]).reshape(1, 3 * D)
    b_qkv = b_qkv.astype(jnp.float32)

    return pl.pallas_call(
        self_attention_kernel,
        out_shape=jax.ShapeDtypeStruct((B, S, D), x.dtype),
        grid_spec=pltpu.PrefetchScalarGridSpec(
            num_scalar_prefetch=0,
            grid=(B,),
            in_specs=[
                pl.BlockSpec((1, S, D), lambda b: (b, 0, 0)),      # x
                pl.BlockSpec((D, 3 * D), lambda b: (0, 0)),        # fused W_qkv
                pl.BlockSpec((1, 3 * D), lambda b: (0, 0)),        # fused b_qkv
            ],
            out_specs=pl.BlockSpec((1, S, D), lambda b: (b, 0, 0)),
        ),
        compiler_params=pltpu.CompilerParams(
            dimension_semantics=("parallel",)),
    )(x, w_qkv, b_qkv)


def self_attention_ref(x, wq, bq, wk, bk, wv, bv):
    q = x @ wq + bq
    k = x @ wk + bk
    v = x @ wv + bv
    scores = (q @ jnp.swapaxes(k, -2, -1)) / (x.shape[-1] ** 0.5)
    attn = jax.nn.softmax(scores, axis=-1)
    return attn @ v + x


if __name__ == "__main__":
    B, S, D = 2, 8, 32
    key = jax.random.PRNGKey(0)
    kx, kq, kbq, kk, kbk, kv, kbv = jax.random.split(key, 7)

    x = jax.random.normal(kx, (B, S, D), dtype=jnp.float32)
    # nn.Linear(input_dim, input_dim) weights, pre-transposed to (in, out).
    bound = 1.0 / (D ** 0.5)
    wq = jax.random.uniform(kq, (D, D), jnp.float32, -bound, bound)
    bq = jax.random.uniform(kbq, (D,), jnp.float32, -bound, bound)
    wk = jax.random.uniform(kk, (D, D), jnp.float32, -bound, bound)
    bk = jax.random.uniform(kbk, (D,), jnp.float32, -bound, bound)
    wv = jax.random.uniform(kv, (D, D), jnp.float32, -bound, bound)
    bv = jax.random.uniform(kbv, (D,), jnp.float32, -bound, bound)

    out = self_attention(x, wq, bq, wk, bk, wv, bv)
    jax.block_until_ready(out)

    ref = self_attention_ref(x, wq, bq, wk, bk, wv, bv)
    # Slightly looser tolerance than 1e-4: approximate EUP reciprocal is used
    # for the softmax normalization (per perf review).
    assert jnp.allclose(out, ref, atol=2e-3, rtol=2e-3), "mismatch vs reference"

    print("KERNEL_OK")
</pallas_src>

<mosaic_0001>
module attributes {stable_mosaic.version = 11 : i64} {
  func.func @self_attention_kernel(%arg0: i32, %arg1: memref<1x8x32xf32, #tpu.memory_space<vmem>>, %arg2: memref<32x96xf32, #tpu.memory_space<vmem>>, %arg3: memref<1x96xf32, #tpu.memory_space<vmem>>, %arg4: memref<1x8x32xf32, #tpu.memory_space<vmem>>) attributes {dimension_semantics = [#tpu.dimension_semantics<parallel>], iteration_bounds = array<i64: 2>, scalar_prefetch = 0 : i64, scratch_operands = 0 : i64, tpu.core_type = #tpu.core_type<tc>, window_params = [{transform_indices = @transform_0, window_bounds = array<i64: 1, 8, 32>}, {pipeline_mode = #tpu.pipeline_mode<synchronous>, transform_indices = @transform_1, window_bounds = array<i64: 32, 96>}, {pipeline_mode = #tpu.pipeline_mode<synchronous>, transform_indices = @transform_2, window_bounds = array<i64: 1, 96>}, {transform_indices = @transform_3, window_bounds = array<i64: 1, 8, 32>}]} {
    %c0 = arith.constant 0 : index
    %c0_0 = arith.constant 0 : index
    %c0_1 = arith.constant 0 : index
    %0 = vector.load %arg1[%c0, %c0_0, %c0_1] : memref<1x8x32xf32, #tpu.memory_space<vmem>>, vector<1x8x32xf32>
    %1 = vector.shape_cast %0 : vector<1x8x32xf32> to vector<8x32xf32>
    %c0_2 = arith.constant 0 : index
    %c0_3 = arith.constant 0 : index
    %2 = vector.load %arg2[%c0_2, %c0_3] : memref<32x96xf32, #tpu.memory_space<vmem>>, vector<32x96xf32>
    %cst = arith.constant dense<0.000000e+00> : vector<8x96xf32>
    %3 = tpu.matmul %1, %2, %cst {dimension_numbers = #tpu.dot_dimension_numbers<[1], [0], [0], [1], [0, 0, 1, 1], [], []>} : vector<8x32xf32>, vector<32x96xf32>, vector<8x96xf32> -> vector<8x96xf32>
    %c0_4 = arith.constant 0 : index
    %c0_5 = arith.constant 0 : index
    %4 = vector.load %arg3[%c0_4, %c0_5] : memref<1x96xf32, #tpu.memory_space<vmem>>, vector<1x96xf32>
    %5 = vector.broadcast %4 : vector<1x96xf32> to vector<8x96xf32>
    %6 = arith.addf %3, %5 : vector<8x96xf32>
    %7 = vector.extract_strided_slice %6 {offsets = [0, 0], sizes = [8, 32], strides = [1, 1]} : vector<8x96xf32> to vector<8x32xf32>
    %8 = vector.extract_strided_slice %6 {offsets = [0, 32], sizes = [8, 32], strides = [1, 1]} : vector<8x96xf32> to vector<8x32xf32>
    %9 = vector.extract_strided_slice %6 {offsets = [0, 64], sizes = [8, 32], strides = [1, 1]} : vector<8x96xf32> to vector<8x32xf32>
    %cst_6 = arith.constant dense<0.000000e+00> : vector<8x8xf32>
    %10 = tpu.matmul %7, %8, %cst_6 {dimension_numbers = #tpu.dot_dimension_numbers<[1], [1], [0], [0], [0, 0, 1, 0], [], []>} : vector<8x32xf32>, vector<8x32xf32>, vector<8x8xf32> -> vector<8x8xf32>
    %cst_7 = arith.constant dense<0xFF800000> : vector<8xf32>
    %11 = vector.multi_reduction <maximumf>, %10, %cst_7 [1] : vector<8x8xf32> to vector<8xf32>
    %12 = vector.shape_cast %11 : vector<8xf32> to vector<8x1xf32>
    %13 = vector.broadcast %12 : vector<8x1xf32> to vector<8x8xf32>
    %14 = arith.subf %10, %13 : vector<8x8xf32>
    %15 = math.exp %14 : vector<8x8xf32>
    %cst_8 = arith.constant dense<0.000000e+00> : vector<8xf32>
    %16 = vector.multi_reduction <add>, %15, %cst_8 [1] : vector<8x8xf32> to vector<8xf32>
    %17 = vector.shape_cast %16 : vector<8xf32> to vector<8x1xf32>
    %cst_9 = arith.constant dense<0.000000e+00> : vector<8x32xf32>
    %18 = tpu.matmul %15, %9, %cst_9 {dimension_numbers = #tpu.dot_dimension_numbers<[1], [0], [0], [1], [0, 0, 1, 1], [], []>} : vector<8x8xf32>, vector<8x32xf32>, vector<8x32xf32> -> vector<8x32xf32>
    %19 = tpu.reciprocal %17 {approx = true} : vector<8x1xf32> -> vector<8x1xf32>
    %20 = vector.broadcast %19 : vector<8x1xf32> to vector<8x32xf32>
    %21 = arith.mulf %18, %20 : vector<8x32xf32>
    %22 = arith.addf %21, %1 : vector<8x32xf32>
    %c0_10 = arith.constant 0 : index
    %c0_11 = arith.constant 0 : index
    %c0_12 = arith.constant 0 : index
    %23 = vector.load %arg4[%c0_10, %c0_11, %c0_12] : memref<1x8x32xf32, #tpu.memory_space<vmem>>, vector<1x8x32xf32>
    %24 = vector.shape_cast %23 : vector<1x8x32xf32> to vector<8x32xf32>
    %25 = vector.shape_cast %22 : vector<8x32xf32> to vector<1x8x32xf32>
    tpu.vector_store %arg4[%c0_10, %c0_11, %c0_12], %25 {strides = array<i32>} : memref<1x8x32xf32, #tpu.memory_space<vmem>>, vector<1x8x32xf32>,
    return
  }
  func.func @transform_0(%arg0: i32) -> (i32, i32, i32) {
    %c0_i32 = arith.constant 0 : i32
    %c0_i32_0 = arith.constant 0 : i32
    %c0_i32_1 = arith.constant 0 : i32
    return %arg0, %c0_i32, %c0_i32_0 : i32, i32, i32
  }
  func.func @transform_1(%arg0: i32) -> (i32, i32) {
    %c0_i32 = arith.constant 0 : i32
    %c0_i32_0 = arith.constant 0 : i32
    %c0_i32_1 = arith.constant 0 : i32
    return %c0_i32, %c0_i32_0 : i32, i32
  }
  func.func @transform_2(%arg0: i32) -> (i32, i32) {
    %c0_i32 = arith.constant 0 : i32
    %c0_i32_0 = arith.constant 0 : i32
    %c0_i32_1 = arith.constant 0 : i32
    return %c0_i32, %c0_i32_0 : i32, i32
  }
  func.func @transform_3(%arg0: i32) -> (i32, i32, i32) {
    %c0_i32 = arith.constant 0 : i32
    %c0_i32_0 = arith.constant 0 : i32
    %c0_i32_1 = arith.constant 0 : i32
    return %arg0, %c0_i32, %c0_i32_0 : i32, i32, i32
  }
}

</mosaic_0001>

<bundles_post_ra>
// kernel: tpu_custom_call.1
= control target key start
LH: loop header
LB: loop body
LE: loop exit
PB: predicated region body
PF: predicated region fallthrough
CT: control target
= control target key end

     0   :  { %8 = vsyncpa [#allocation3], 0  ;;  %s1041_s0 = inlined_call_operand.hbm [shape: f32[2,8,32], index: 0, kind: input, shape index: {}]   ;;  %s1042_s1 = inlined_call_operand.hbm [shape: f32[32,96], index: 1, kind: input, shape index: {}]   ;;  %s1043_s2 = inlined_call_operand.vmem [shape: f32[1,96], index: 2, kind: input, shape index: {}]   ;;  %s1044_s3 = inlined_call_operand.hbm [shape: f32[2,8,32], index: 3, kind: output, shape index: {}]  }
   0x1   :  { %10 = vsyncpa [#allocation3 + $0x1], 0 }
   0x2   :  { %11 = vsyncpa [#allocation6], 0 }
   0x3   :  { %12 = vsyncpa [#allocation4], 0 }
   0x4   :  { %14 = vsyncpa [#allocation4 + $0x1], 0  ;;  %s831_s12 = smov 0   ;;  %s833_s13 = smov 0  }
   0x5   :  { %s835_s14 = smov 0   ;;  %s837_s15 = smov 0  }
   0x6 LB: > { %s852_s16 = sadd.s32 4294967295, %s799_s15   ;;  %s548_s17 = sadd.s32 4294967294, %s799_s15   ;;  %s799_s15 = sphi %s837_s15, %s1064_s15   ;;  %s795_s14 = sphi %s835_s14, %s1063_s14   ;;  %s791_s13 = sphi %s833_s13, %s1062_s13   ;;  %s787_s12 = sphi %s831_s12, %s1061_s12  }
   0x7   : > { %p40_p0 = scmp.ne.s32.totalorder %s791_s13, %s787_s12  ;;  %p1045_p1 = scmp.eq.s32.totalorder %s852_s16, 0 }
   0x8   : > { %p112_p3 = scmp.eq.s32.totalorder %s548_s17, 1  ;;  %p549_p5 = scmp.ge.s32.totalorder %s799_s15, 1 }
   0x9   : > { %p861_p4 = por %p1045_p1, %p40_p0  ;;  %p119_p7 = scmp.lt.s32.totalorder %s799_s15, 3 }
   0xa   : > { %p866_p6 = por %p112_p3, %p40_p0  ;;  %s801_s21 = smov [#allocation5]  }
   0xb   : > { %s1048_s18 = scalar_select %p861_p4, 1, 0 }
   0xc   : > { %s1049_s19 = scalar_select %p866_p6, 1, 0 }
   0xd   : > { %p871_p8 = pnand %p549_p5, %p119_p7  ;;  %s131_s22 = sshll.u32 %s801_s21, 4  ;;  %s875_s22 = int_to_ptr.vmem [resolvable:$true] %s131_s22 }
   0xe   : > { %s887_s24 = sadd.s32 1, %s799_s15   ;;  %s27_s25 = sadd.s32 1, %s795_s14 }
   0xf   : > { %s1050_s20 = scalar_select %p871_p8, 1, 0 }
  0x10   : > { %p611_p9 = pneg %p871_p8  ;;  %s24_s26 = ssub.s32 %s799_s15, %s887_s24 }
  0x11   : > { %s671_s29 = scalar_lea.hbm %s1042_s1, 512 }
  0x12   : > { %p882_p11 = pnand %p611_p9, %p1045_p1  ;;  %p672_p12 = scmp.ne.s32.totalorder %s1042_s1, %s671_s29 }
  0x13   : > { %p678_p5 = scmp.lt.u32.totalorder %s671_s29, %s1042_s1 }
  0x14   : > { %p673_p13 = pneg %p882_p11 }
  0x16   : > { %p674_p0 = pnand %p673_p13, %p672_p12 }
  0x18   : > { %p675_p3 = pneg %p674_p0 }
  0x1a   : > { %p680_p7 = pnand %p678_p5, %p675_p3 }
  0x1c   : > { %683 = shalt.err (!%p680_p7)
}
  0x1d   : > { %s684_s7 = scalar_lea.vmem %s875_s22, 512  ;;  %p692_p2 = scmp.lt.s32.totalorder %s875_s22, %s875_s22 }
  0x1e   : > { %p685_p9 = scmp.ne.s32.totalorder %s875_s22, %s684_s7  ;;  %p693_p6 = scmp.lt.s32.totalorder %s684_s7, %s684_s7 }
  0x20   : > { %p687_p10 = pnand %p685_p9, %p673_p13  ;;  %p694_p4 = por %p693_p6, %p692_p2 }
  0x22   : > { %p688_p1 = pneg %p687_p10 }
  0x24   : > { %p695_p8 = pnand %p694_p4, %p688_p1 }
  0x26   : > { %698 = shalt.err (!%p695_p8)
}
  0x27   : > { %s802_s8 = smov 128   ;;  %s803_s9 = smov 8  }
  0x28   : > { %614 = dma.hbm_to_vmem [thread:$0]  (!%p882_p11), %s1042_s1, 512, %s875_s22, [#allocation6], %s802_s8, %s802_s8, %s803_s9  }
  0x29   : > { %p25_p2 = scmp.eq.s32.totalorder %s24_s26, 0  ;;  %p34_p1 = scmp.ne.s32.totalorder %s795_s14, %s791_s13 }
  0x2a   : > { %p35_p4 = scmp.eq.s32.totalorder %s799_s15, 0  ;;  %p624_p6 = scmp.lt.s32.totalorder %s799_s15, 2 }
  0x2b   : > { %s918_s17 = scalar_select %p25_p2, %s795_s14, %s27_s25  }
  0x2c   : > { %p36_p8 = por %p35_p4, %p34_p1  ;;  %p1052_p10 = scmp.eq.s32.totalorder %s852_s16, 1 }
  0x2d   : > { %s148_s27 = sand.u32 1, %s795_s14   ;;  %s553_s28 = sshll.u32 %s799_s15, 7 }
  0x2e   : > { %p922_p12 = por %p1052_p10, %p34_p1  ;;  %s552_s29 = sshll.u32 %s148_s27, 3 }
  0x2f   : > { %s931_s4 = scalar_lea.hbm %s1041_s0, %s553_s28  ;;  %s152_s22 = scalar_lea.vmem [#allocation2], %s552_s29 }
  0x30   : > { %s159_s25 = sshll.u32 %s152_s22, 4  ;;  %p933_p11 = pnand %p624_p6, %p36_p8  ;;  %s937_s25 = int_to_ptr.vmem [resolvable:$true] %s159_s25 }
  0x31   : > { %s149_s5 = scalar_lea.sflag [#allocation3], %s148_s27  ;;  %s699_s6 = scalar_lea.hbm %s931_s4, 128 }
  0x32   : > { %p700_p13 = scmp.ne.s32.totalorder %s931_s4, %s699_s6  ;;  %p701_p0 = pneg %p933_p11 }
  0x33   : > { %s704_s9 = scalar_lea.hbm %s1041_s0, 256  ;;  %p705_p7 = scmp.lt.u32.totalorder %s931_s4, %s1041_s0 }
  0x34   : > { %p702_p3 = pnand %p701_p0, %p700_p13  ;;  %p706_p9 = scmp.lt.u32.totalorder %s704_s9, %s699_s6 }
  0x35   : > { %p708_p1 = scmp.lt.u32.totalorder %s699_s6, %s931_s4 }
  0x36   : > { %p703_p5 = pneg %p702_p3  ;;  %p707_p2 = por %p706_p9, %p705_p7 }
  0x38   : > { %p709_p4 = por %p708_p1, %p707_p2 }
  0x3a   : > { %p710_p6 = pnand %p709_p4, %p703_p5 }
  0x3c   : > { %713 = shalt.err (!%p710_p6)
}
  0x3d   : > { %s714_s27 = scalar_lea.vmem %s937_s25, 128  ;;  %s804_s28 = smov [#allocation2]  }
  0x3e   : > { %p715_p8 = scmp.ne.s32.totalorder %s937_s25, %s714_s27  ;;  %s719_s29 = sshll.u32 %s804_s28, 4  ;;  %s720_s29 = int_to_ptr.vmem [resolvable:$false] %s719_s29 }
  0x3f   : > { %s721_s23 = scalar_lea.vmem %s720_s29, 256  ;;  %p722_p3 = scmp.lt.s32.totalorder %s937_s25, %s720_s29 }
  0x40   : > { %p717_p10 = pnand %p715_p8, %p701_p0  ;;  %p723_p7 = scmp.lt.s32.totalorder %s721_s23, %s714_s27 }
  0x42   : > { %p718_p13 = pneg %p717_p10  ;;  %p724_p9 = por %p723_p7, %p722_p3 }
  0x44   : > { %p725_p2 = pnand %p724_p9, %p718_p13 }
  0x46   : > { %728 = shalt.err (!%p725_p2)
}
  0x47   : > { %618 = dma.hbm_to_vmem [thread:$0]  (!%p933_p11), %s931_s4, 128, %s937_s25, %s149_s5  }
  0x48   : > { %p1055_p5 = scmp.ne.s32.totalorder %s1050_s20, 0 }
  0x49   : > { %s967_s30 = sand.u32 (!%p1055_p5), 1, %s791_s13   ;;  %p1056_p0 = scmp.ne.s32.totalorder (!%p1055_p5), %s1048_s18, 0 }
  0x4a   : > { %168 = sbr.rel (%p1055_p5) target bundleno = 1027 (0x403), region = 32  ;;  %s555_s22 = sshll.u32 (!%p1055_p5), %s967_s30, 3 }
  0x4b   : > { %s171_s6 = scalar_lea.sflag (!%p1055_p5), [#allocation3], %s967_s30  ;;  %s174_s7 = scalar_lea.vmem (!%p1055_p5), [#allocation2], %s555_s22 }
  0x51   : > { %774 = dma.done.wait (%p1056_p0), %s171_s6, 128  }
  0x52   : > { %776 = vsyncadd (%p1056_p0), %s171_s6, 4294967168  ;;  %p1057_p11 = scmp.eq.s32.totalorder %s852_s16, 0 }
  0x54   : > { %778 = dma.done.wait (%p1057_p11), [#allocation6], 512   ;;  %p1058_p1 = pmov %p1057_p11 }
  0x55   : > { %v805_v0 = vmov 0.0|0.0   ;;  %vm806_vm0 = vmmov 0   ;;  %v807_v1 = vmov 0.0   ;;  %v202_v2 = vld [vmem:[#allocation5] sm:$0xff]  ;;  %v203_v3 = vld [vmem:[#allocation5 + $0x8] sm:$0xff]  ;;  %v204_v4 = vld [vmem:[#allocation5 + $0x10] sm:$0xff] }
  0x56   : > { %780 = vsyncadd (%p1058_p1), [#allocation6], 4294966784  ;;  %597 = vmatprep.subr.bf16.mxu0 %v805_v0  ;;  %584 = vmatprep.mubr.msk.f32.mxu0 %vm806_vm0, %v807_v1  ;;  %v598_v5 = vpack.c.bf16 %v203_v3, %v202_v2  ;;  %v205_v6 = vld [vmem:[#allocation5 + $0x18] sm:$0xff]  ;;  %vm213_vm1 = vcmask 261120   ;;  %v558_v9 = vld [vmem:[%s1043_s2] ss:$0 sm:$0xff] }
  0x57   : > { %587 = vmatprep.subr.mxu1 %v807_v1  ;;  %589 = vmatprep.mubr.msk.f32.mxu1 %vm806_vm0, %v807_v1  ;;  %v601_v7 = vpack.c.bf16 %v205_v6, %v204_v4  ;;  %v201_v8 = vld [vmem:[%s174_s7] sm:$0xff]  ;;  %s808_s4 = smov 64   ;;  %s809_s25 = smov 96   ;;  %vm364_vm2 = vcmask 64512  }
  0x58   : > { %599 = vmatpush3.bf16.msra.mxu0 %v598_v5  ;;  %s564_s26 = sshll.u32 %s852_s16, 7  ;;  %s200_s5 = scalar_lea.vmem [#allocation7], %s555_s22 }
  0x59   : > { %600 = vmatprep.subr.bf16.mxu0 %v805_v0  ;;  %s468_s8 = sshll.u32 %s200_s5, 4  ;;  %s996_s11 = scalar_lea.hbm %s1044_s3, %s564_s26  ;;  %s998_s8 = int_to_ptr.vmem [resolvable:$true] %s468_s8 }
  0x5a   : > { %s455_s27 = scalar_lea.sflag [#allocation4], %s967_s30  ;;  %s729_s16 = scalar_lea.vmem %s998_s8, 128 }
  0x5b   : > { %p730_p4 = scmp.ne.s32.totalorder %s998_s8, %s729_s16  ;;  %s810_s28 = smov [#allocation7]  }
  0x5c   : > { %602 = vmatpush3.bf16.msra.mxu0 %v601_v7  ;;  %s733_s29 = sshll.u32 %s810_s28, 4  ;;  %s734_s29 = int_to_ptr.vmem [resolvable:$false] %s733_s29 }
  0x5d   : > { %p731_p6 = pnand %p730_p4, %p922_p12  ;;  %s735_s23 = scalar_lea.vmem %s734_s29, 256 }
  0x5e   : > { %p736_p10 = scmp.lt.s32.totalorder %s998_s8, %s734_s29  ;;  %p737_p13 = scmp.lt.s32.totalorder %s735_s23, %s729_s16 }
  0x5f   : > { %585 = vmatmul.mubr.msk.f32.vlgmr.msra.gmra.mrb[0].mxu0 %vm213_vm1, %v201_v8  ;;  %p732_p8 = pneg %p731_p6 }
  0x60   : > { %p738_p3 = por %p737_p13, %p736_p10 }
  0x62   : > { %p739_p7 = pnand %p738_p3, %p732_p8 }
 0x132   : > { %v283_v10 = vpop.f32.mrb[0].mxu0 }
 0x133   : > { %v284_v11 = vadd.f32 %v558_v9, %v283_v10  ;;  %v586_v12 = vpop.f32.mrb[1].mxu0 }
 0x135   : > { %374 = vrot.lane.b32.xlu1 %v284_v11, %s808_s4  ;;  %288 = vrot.lane.b32.xlu0 %v284_v11, %s809_s25 }
 0x1a7   : > { %v289_v13 = vpop.permute.xlu0 %288  ;;  %v375_v14 = vpop.permute.xlu1 %374 }
 0x1a8   : > { %588 = vmatpush3.xpose.msk.msra.mxu1 %vm213_vm1, %v289_v13 }
 0x1a9   : > { %592 = vmatprep.subr.mxu1 %v807_v1 }
 0x1ab   : > { %590 = vmatmul.mubr.msk.f32.vlgmr.msra.gmra.mrb[0].mxu1 %vm213_vm1, %v284_v11 }
 0x1ac   : > { %593 = vmatpush3.msra.mxu1 %v375_v14  ;;  %594 = vmatprep.mubr.msk.f32.mxu1 %vm806_vm0, %v807_v1 }
 0x27e   : > { %v360_v15 = vpop.f32.mrb[0].mxu1 }
 0x27f   : > { %v591_v16 = vpop.f32.mrb[1].mxu1  ;;  %v365_v17 = vsel %vm364_vm2, %v360_v15, -inf }
 0x280   : > { %366 = vmax.xlane.f32.xlu0 %v365_v17 }
 0x30d   : > { %v367_v18 = vpop.xlane.xlu0 %366 }
 0x30e   : > { %v368_v19 = vsub.f32 %v360_v15, %v367_v18 }
 0x310   : > { %v369_v20 = vmul.f32 1.442695, %v368_v19 }
 0x312   : > { %667 = vpow2.f32 %v369_v20 }
 0x31c   : > { %v668_v21 = vpop.eup %667 }
 0x31d   : > { %595 = vmatmul.mubr.msk.f32.vlgmr.msra.gmra.mrb[2].mxu1 %vm364_vm2, %v668_v21  ;;  %v371_v22 = vsel %vm364_vm2, %v668_v21, 0.0 }
 0x31e   : > { %372 = vadd.xlane.f32.xlu1 %v371_v22 }
 0x3ab   : > { %v373_v23 = vpop.xlane.xlu1 %372 }
 0x3ac   : > { %669 = vrcp.f32 %v373_v23 }
 0x3b6   : > { %v670_v24 = vpop.eup %669 }
 0x3f0   : > { %v446_v25 = vpop.f32.mrb[2].mxu1 }
 0x3f1   : > { %v451_v26 = vmul.f32 %v670_v24, %v446_v25  ;;  %v596_v27 = vpop.f32.mrb[3].mxu1 }
 0x3f3   : > { %v452_v28 = vadd.f32 %v451_v26, %v201_v8 }
 0x3f5   : > { %453 = vst.msk [vmem:[%s200_s5] sm:$0xff] %vm213_vm1, %v452_v28 }
 0x3f6   : > { %742 = shalt.err (!%p739_p7)
}
 0x3f7   : > { %s743_s30 = scalar_lea.hbm %s996_s11, 128  ;;  %s747_s7 = scalar_lea.hbm %s1044_s3, 256 }
 0x3f8   : > { %p744_p9 = scmp.ne.s32.totalorder %s996_s11, %s743_s30  ;;  %p748_p0 = scmp.lt.u32.totalorder %s996_s11, %s1044_s3 }
 0x3f9   : > { %p749_p11 = scmp.lt.u32.totalorder %s747_s7, %s743_s30  ;;  %p751_p4 = scmp.lt.u32.totalorder %s743_s30, %s996_s11 }
 0x3fa   : > { %p745_p2 = pnand %p744_p9, %p922_p12 }
 0x3fb   : > { %p750_p1 = por %p749_p11, %p748_p0 }
 0x3fc   : > { %p746_p5 = pneg %p745_p2 }
 0x3fd   : > { %p752_p6 = por %p751_p4, %p750_p1 }
 0x3ff   : > { %p753_p8 = pnand %p752_p6, %p746_p5 }
 0x401   : > { %756 = shalt.err (!%p753_p8)
}
 0x402   : > { %609 = dma.vmem_to_hbm [thread:$0]  (%p922_p12), %s998_s8, 128, %s996_s11, %s455_s27  }
 0x403 PF: > { %s480_s4 = sand.u32 1, %s787_s12   ;;  %p1059_p10 = scmp.ne.s32.totalorder %s1049_s19, 0 }
 0x404   : > { %p1060_p13 = scmp.ge.s32.totalorder %s799_s15, 2  ;;  %s481_s25 = scalar_lea.sflag [#allocation4], %s480_s4 }
 0x406   : > { %p620_p3 = pnand %p1060_p13, %p1059_p10 }
 0x408   : > { %782 = dma.done.wait (!%p620_p3), %s481_s25, 128  }
 0x409   : > { %784 = vsyncadd (!%p620_p3), %s481_s25, 4294967168  ;;  %p17_p7 = scmp.ge.s32.totalorder %s887_s24, 4   ;;  %s1061_s12 = smov %s791_s13 }
 0x40a   : > { %s1062_s13 = smov %s795_s14  ;;  %s1063_s14 = smov %s918_s17 }
 0x40b   : > { %s1064_s15 = smov %s887_s24  ;;  %19 = sbr.rel (!%p17_p7) target bundleno = 6 (0x6), region = 81 }
 0x412   :  { %486 = vsyncpa [#allocation3], 1 }
 0x413   :  { %488 = vsyncpa [#allocation3 + $0x1], 1 }
 0x414   :  { %489 = vsyncpa [#allocation6], 1 }
 0x415   :  { %490 = vsyncpa [#allocation4], 1 }
 0x416   :  { %492 = vsyncpa [#allocation4 + $0x1], 1 }

</bundles_post_ra>
